<compile_context>
chip_gen: v6e
topology: v6e:2x2x1
jax: 0.10.0
libtpu: 0.0.40
codegen_flags: <defaults>
</compile_context>

<pallas_src>
import math
import functools

import jax
import jax.numpy as jnp
from jax import lax
from jax.experimental import pallas as pl
from jax.experimental.pallas import tpu as pltpu
import numpy as np

NEG_INF = -1e30  # large finite negative; avoids NaN in the online softmax


def _pick_vmem_limit_bytes():
    """Per-generation VMEM budget with headroom below physical capacity
    (64 MiB/TC on v7x, 128 MiB on v5e/v6e)."""
    try:
        phys = int(pltpu.get_tpu_info().vmem_capacity_bytes)
    except Exception:
        phys = None
    if phys is None:
        return 48 * 1024 * 1024                      # safe on every generation
    if phys >= 128 * 1024 * 1024:                    # v5e / v6e
        return 100 * 1024 * 1024
    return min(phys - 16 * 1024 * 1024, 48 * 1024 * 1024)   # v7x-class


# --------------------------------------------------------------------------
# Kernel 1: fused Q/K/V projection -> head-major bf16 [B, H, S, hd]
# --------------------------------------------------------------------------
def _qkv_proj_kernel(x_ref, wq_ref, wk_ref, wv_ref, q_ref, k_ref, v_ref,
                     *, n_heads, head_dim, block, inv_scale):
    x = x_ref[0]                                                   # [block, D] bf16

    def project(w_ref, scale=None):
        y = jnp.dot(x, w_ref[...], preferred_element_type=jnp.float32)  # [block, D]
        if scale is not None:
            y = y * scale
        y = y.reshape(block, n_heads, head_dim)
        return jnp.transpose(y, (1, 0, 2)).astype(jnp.bfloat16)   # [H, block, hd]

    q_ref[0] = project(wq_ref, inv_scale)   # fold 1/sqrt(hd) into Q once
    k_ref[0] = project(wk_ref)
    v_ref[0] = project(wv_ref)


# --------------------------------------------------------------------------
# Kernel 2: flash attention (online softmax) with fused output projection
# --------------------------------------------------------------------------
def _flash_attn_kernel(q_ref, k_ref, v_ref, bias_ref, wo_ref, bo_ref, o_ref,
                       m_sc, l_sc, acc_sc, *, block_q, block_k):
    qi = pl.program_id(1)
    ki = pl.program_id(2)

    @pl.when(ki == 0)
    def _init():
        m_sc[...] = jnp.full_like(m_sc, NEG_INF)
        l_sc[...] = jnp.zeros_like(l_sc)
        acc_sc[...] = jnp.zeros_like(acc_sc)

    # Skip kv blocks entirely in the causal future of this q tile (their DMAs
    # are also elided because the kv index_map clamps the block index).
    @pl.when(ki * block_k <= qi * block_q + (block_q - 1))
    def _update():
        q = q_ref[0]                                               # [H, tq, hd] bf16
        k = k_ref[0]                                               # [H, tk, hd] bf16
        v = v_ref[0]                                               # [H, tk, hd] bf16

        s = jnp.einsum('hqd,hkd->hqk', q, k,
                       preferred_element_type=jnp.float32)         # [H, tq, tk] f32
        # Additive key-padding bias (0 / -1e30), precomputed in the wrapper.
        s = s + bias_ref[0][None, :, :]

        # Apply the causal mask only on blocks that intersect the diagonal.
        on_diag = ki * block_k + (block_k - 1) > qi * block_q

        def _apply_causal(sv):
            rows = qi * block_q + lax.broadcasted_iota(
                jnp.int32, (block_q, block_k), 0)
            cols = ki * block_k + lax.broadcasted_iota(
                jnp.int32, (block_q, block_k), 1)
            return jnp.where((cols > rows)[None, :, :], NEG_INF, sv)

        s = lax.cond(on_diag, _apply_causal, lambda sv: sv, s)

        # Online (flash) softmax update.
        m_prev = m_sc[...]
        m_new = jnp.maximum(m_prev, jnp.max(s, axis=-1, keepdims=True))  # [H,tq,1]
        alpha = jnp.exp(m_prev - m_new)
        p = jnp.exp(s - m_new)
        l_sc[...] = alpha * l_sc[...] + jnp.sum(p, axis=-1, keepdims=True)
        acc_sc[...] = alpha * acc_sc[...] + jnp.einsum(
            'hqk,hkd->hqd', p.astype(jnp.bfloat16), v,
            preferred_element_type=jnp.float32)
        m_sc[...] = m_new

    @pl.when(ki == pl.num_programs(2) - 1)
    def _finalize():
        # Clamp l so degenerate fully-masked rows can never produce Inf*0.
        l = jnp.maximum(l_sc[...], 1e-30)
        out_h = (acc_sc[...] * pl.reciprocal(l, approx=True)).astype(jnp.bfloat16)
        # Fused output projection: per-head [tq, hd] @ [hd, D], then head-sum.
        proj = jnp.einsum('hqd,hdf->hqf', out_h, wo_ref[...],
                          preferred_element_type=jnp.float32)       # [H, tq, D]
        o_ref[0] = (jnp.sum(proj, axis=0) + bo_ref[...]).astype(o_ref.dtype)


# --------------------------------------------------------------------------
# Wrapper
# --------------------------------------------------------------------------
def multi_head_attention(x, w_q, w_k, w_v, w_o, b_o, pad_mask, n_heads,
                         *, block_q=None, block_k=None, block_p=None):
    """x: [B, S, D]; w_*: [D, D] (PyTorch nn.Linear convention, out x in);
    b_o: [D]; pad_mask: [B, S] (1 = keep, 0 = pad)."""
    B, S, D = x.shape
    assert D % n_heads == 0
    hd = D // n_heads
    inv_scale = 1.0 / math.sqrt(hd)

    vmem_limit = _pick_vmem_limit_bytes()
    default_blk = 512 if vmem_limit >= 96 * 1024 * 1024 else 256
    if block_q is None:
        block_q = min(S, default_blk)
    if block_k is None:
        block_k = min(S, block_q)
    if block_p is None:
        block_p = block_q
    assert S % block_q == 0 and S % block_k == 0 and S % block_p == 0
    # Keep the kv-clamp index math division-free (scalar-core friendly).
    assert block_q % block_k == 0
    kv_ratio = block_q // block_k

    # One-time layout / dtype prep in the wrapper: bf16 activations & weights
    # (halves HBM traffic into the kernels; all matmuls accumulate in f32).
    x_bf = x.astype(jnp.bfloat16)
    wq_t = w_q.T.astype(jnp.bfloat16)                              # y = x @ w.T
    wk_t = w_k.T.astype(jnp.bfloat16)
    wv_t = w_v.T.astype(jnp.bfloat16)
    wo_h = w_o.T.reshape(n_heads, hd, D).astype(jnp.bfloat16)      # [H, hd, D]
    b_o2 = b_o.reshape(1, D).astype(jnp.float32)
    # Additive key-padding bias (0 keep / NEG_INF masked), [B, 1, S].
    pad_bias = jnp.where(pad_mask == 0, NEG_INF, 0.0).astype(jnp.float32)
    pad_bias = pad_bias.reshape(B, 1, S)

    def weight_spec(shape):
        # Constant block index -> single-buffer it (no re-DMA ever needed).
        return pl.BlockSpec(shape, lambda *idx: (0,) * len(shape),
                            pipeline_mode=pl.Buffered(1))

    # ---- Stage 1: Q/K/V projections, written head-major bf16 ----
    qkv_kernel = functools.partial(
        _qkv_proj_kernel, n_heads=n_heads, head_dim=hd, block=block_p,
        inv_scale=inv_scale)
    qkv_shape = jax.ShapeDtypeStruct((B, n_heads, S, hd), jnp.bfloat16)
    hm_out_spec = pl.BlockSpec((1, n_heads, block_p, hd), lambda b, i: (b, 0, i, 0))

    q_hm, k_hm, v_hm = pl.pallas_call(
        qkv_kernel,
        out_shape=(qkv_shape, qkv_shape, qkv_shape),
        grid_spec=pltpu.PrefetchScalarGridSpec(
            num_scalar_prefetch=0,
            grid=(B, S // block_p),
            in_specs=[
                pl.BlockSpec((1, block_p, D), lambda b, i: (b, i, 0)),   # x
                weight_spec((D, D)),                                     # wq^T
                weight_spec((D, D)),                                     # wk^T
                weight_spec((D, D)),                                     # wv^T
            ],
            out_specs=(hm_out_spec, hm_out_spec, hm_out_spec),
        ),
        compiler_params=pltpu.CompilerParams(
            dimension_semantics=("parallel", "parallel"),
            vmem_limit_bytes=vmem_limit),
    )(x_bf, wq_t, wk_t, wv_t)

    # ---- Stage 2: flash attention + fused output projection ----
    def q_index(b, qi, ki):
        return (b, 0, qi, 0)

    def kv_index(b, qi, ki):
        # Clamp so causally-dead kv blocks repeat the previous block index and
        # trigger no DMA (their compute is skipped by pl.when in the kernel).
        last = qi * kv_ratio + (kv_ratio - 1)
        return (b, 0, jnp.minimum(ki, last), 0)

    def bias_index(b, qi, ki):
        last = qi * kv_ratio + (kv_ratio - 1)
        return (b, 0, jnp.minimum(ki, last))

    attn_kernel = functools.partial(
        _flash_attn_kernel, block_q=block_q, block_k=block_k)

    out = pl.pallas_call(
        attn_kernel,
        out_shape=jax.ShapeDtypeStruct((B, S, D), x.dtype),
        grid_spec=pltpu.PrefetchScalarGridSpec(
            num_scalar_prefetch=0,
            grid=(B, S // block_q, S // block_k),
            in_specs=[
                pl.BlockSpec((1, n_heads, block_q, hd), q_index),     # Q (bf16)
                pl.BlockSpec((1, n_heads, block_k, hd), kv_index),    # K (bf16)
                pl.BlockSpec((1, n_heads, block_k, hd), kv_index),    # V (bf16)
                pl.BlockSpec((1, 1, block_k), bias_index),            # pad bias
                weight_spec((n_heads, hd, D)),                        # wo [H,hd,D]
                weight_spec((1, D)),                                  # b_o
            ],
            out_specs=pl.BlockSpec((1, block_q, D), lambda b, qi, ki: (b, qi, 0)),
            scratch_shapes=[
                pltpu.VMEM((n_heads, block_q, 1), jnp.float32),   # running max
                pltpu.VMEM((n_heads, block_q, 1), jnp.float32),   # running sum
                pltpu.VMEM((n_heads, block_q, hd), jnp.float32),  # output acc
            ],
        ),
        compiler_params=pltpu.CompilerParams(
            dimension_semantics=("parallel", "parallel", "arbitrary"),
            vmem_limit_bytes=vmem_limit),
    )(q_hm, k_hm, v_hm, pad_bias, wo_h, b_o2)
    return out


# --------------------------------------------------------------------------
# Pure-JAX reference (PyTorch forward, dropout in eval mode)
# --------------------------------------------------------------------------
def mha_reference(x, w_q, w_k, w_v, w_o, b_o, pad_mask, n_heads):
    B, S, D = x.shape
    hd = D // n_heads
    scale = math.sqrt(hd)
    q = (x @ w_q.T).reshape(B, S, n_heads, hd).transpose(0, 2, 1, 3)
    k = (x @ w_k.T).reshape(B, S, n_heads, hd).transpose(0, 2, 1, 3)
    v = (x @ w_v.T).reshape(B, S, n_heads, hd).transpose(0, 2, 1, 3)
    scores = jnp.einsum("bhqd,bhkd->bhqk", q, k) / scale
    causal = jnp.triu(jnp.ones((S, S), bool), k=1)
    scores = jnp.where(causal[None, None], -jnp.inf, scores)
    scores = jnp.where(pad_mask[:, None, None, :] == 0, -jnp.inf, scores)
    attn = jax.nn.softmax(scores, axis=-1)
    out = jnp.einsum("bhqk,bhkd->bhqd", attn, v)
    out = out.transpose(0, 2, 1, 3).reshape(B, S, D)
    return out @ w_o.T + b_o


if __name__ == "__main__":
    B, S, D, H = 2, 8, 32, 4

    key = jax.random.PRNGKey(0)
    kx, kq, kk, kv, ko, kb = jax.random.split(key, 6)
    x = jax.random.normal(kx, (B, S, D), jnp.float32)
    # nn.Linear weights are [out_features, in_features]; deterministic init.
    bound = 1.0 / math.sqrt(D)
    w_q = jax.random.uniform(kq, (D, D), jnp.float32, -bound, bound)
    w_k = jax.random.uniform(kk, (D, D), jnp.float32, -bound, bound)
    w_v = jax.random.uniform(kv, (D, D), jnp.float32, -bound, bound)
    w_o = jax.random.uniform(ko, (D, D), jnp.float32, -bound, bound)
    b_o = jax.random.uniform(kb, (D,), jnp.float32, -bound, bound)
    # Padding mask exercising the key-mask path (last two positions of batch 1).
    pad_mask = jnp.ones((B, S), jnp.float32).at[1, -2:].set(0.0)

    out = multi_head_attention(x, w_q, w_k, w_v, w_o, b_o, pad_mask, H)
    out = jax.block_until_ready(out)

    ref = mha_reference(x, w_q, w_k, w_v, w_o, b_o, pad_mask, H)
    # bf16 matmuls / bf16 Q,K,V storage with f32 accumulation vs pure-f32
    # reference -> ~1%-level differences expected.
    np.testing.assert_allclose(np.asarray(out), np.asarray(ref),
                               rtol=3e-2, atol=3e-2)
    print("KERNEL_OK")
</pallas_src>

<mosaic_0001>
module attributes {stable_mosaic.version = 11 : i64} {
  func.func @_qkv_proj_kernel(%arg0: i32, %arg1: i32, %arg2: memref<1x8x32xbf16, #tpu.memory_space<vmem>>, %arg3: memref<32x32xbf16, #tpu.memory_space<vmem>>, %arg4: memref<32x32xbf16, #tpu.memory_space<vmem>>, %arg5: memref<32x32xbf16, #tpu.memory_space<vmem>>, %arg6: memref<1x4x8x8xbf16, #tpu.memory_space<vmem>>, %arg7: memref<1x4x8x8xbf16, #tpu.memory_space<vmem>>, %arg8: memref<1x4x8x8xbf16, #tpu.memory_space<vmem>>) attributes {dimension_semantics = [#tpu.dimension_semantics<parallel>, #tpu.dimension_semantics<parallel>], iteration_bounds = array<i64: 2, 1>, scalar_prefetch = 0 : i64, scratch_operands = 0 : i64, tpu.core_type = #tpu.core_type<tc>, window_params = [{transform_indices = @transform_0, window_bounds = array<i64: 1, 8, 32>}, {pipeline_mode = #tpu.pipeline_mode<synchronous>, transform_indices = @transform_1, window_bounds = array<i64: 32, 32>}, {pipeline_mode = #tpu.pipeline_mode<synchronous>, transform_indices = @transform_2, window_bounds = array<i64: 32, 32>}, {pipeline_mode = #tpu.pipeline_mode<synchronous>, transform_indices = @transform_3, window_bounds = array<i64: 32, 32>}, {transform_indices = @transform_4, window_bounds = array<i64: 1, 4, 8, 8>}, {transform_indices = @transform_5, window_bounds = array<i64: 1, 4, 8, 8>}, {transform_indices = @transform_6, window_bounds = array<i64: 1, 4, 8, 8>}]} {
    %c0 = arith.constant 0 : index
    %c0_0 = arith.constant 0 : index
    %c0_1 = arith.constant 0 : index
    %0 = vector.load %arg2[%c0, %c0_0, %c0_1] : memref<1x8x32xbf16, #tpu.memory_space<vmem>>, vector<1x8x32xbf16>
    %1 = vector.shape_cast %0 : vector<1x8x32xbf16> to vector<8x32xbf16>
    %c0_2 = arith.constant 0 : index
    %c0_3 = arith.constant 0 : index
    %2 = vector.load %arg3[%c0_2, %c0_3] : memref<32x32xbf16, #tpu.memory_space<vmem>>, vector<32x32xbf16>
    %cst = arith.constant dense<0.000000e+00> : vector<8x32xf32>
    %3 = tpu.matmul %1, %2, %cst {dimension_numbers = #tpu.dot_dimension_numbers<[1], [0], [0], [1], [0, 0, 1, 1], [], []>} : vector<8x32xbf16>, vector<32x32xbf16>, vector<8x32xf32> -> vector<8x32xf32>
    %cst_4 = arith.constant 0.353553385 : f32
    %4 = vector.broadcast %cst_4 : f32 to vector<8x32xf32>
    %5 = arith.mulf %3, %4 : vector<8x32xf32>
    %6 = vector.shape_cast %5 : vector<8x32xf32> to vector<8x4x8xf32>
    %7 = tpu.transpose %6, [1, 0, 2] : vector<8x4x8xf32> -> vector<4x8x8xf32>
    %8 = arith.truncf %7 : vector<4x8x8xf32> to vector<4x8x8xbf16>
    %c0_5 = arith.constant 0 : index
    %c0_6 = arith.constant 0 : index
    %c0_7 = arith.constant 0 : index
    %c0_8 = arith.constant 0 : index
    %9 = vector.load %arg6[%c0_5, %c0_6, %c0_7, %c0_8] : memref<1x4x8x8xbf16, #tpu.memory_space<vmem>>, vector<1x4x8x8xbf16>
    %10 = vector.shape_cast %9 : vector<1x4x8x8xbf16> to vector<4x8x8xbf16>
    %11 = vector.shape_cast %8 : vector<4x8x8xbf16> to vector<1x4x8x8xbf16>
    tpu.vector_store %arg6[%c0_5, %c0_6, %c0_7, %c0_8], %11 {strides = array<i32>} : memref<1x4x8x8xbf16, #tpu.memory_space<vmem>>, vector<1x4x8x8xbf16>,
    %c0_9 = arith.constant 0 : index
    %c0_10 = arith.constant 0 : index
    %12 = vector.load %arg4[%c0_9, %c0_10] : memref<32x32xbf16, #tpu.memory_space<vmem>>, vector<32x32xbf16>
    %cst_11 = arith.constant dense<0.000000e+00> : vector<8x32xf32>
    %13 = tpu.matmul %1, %12, %cst_11 {dimension_numbers = #tpu.dot_dimension_numbers<[1], [0], [0], [1], [0, 0, 1, 1], [], []>} : vector<8x32xbf16>, vector<32x32xbf16>, vector<8x32xf32> -> vector<8x32xf32>
    %14 = vector.shape_cast %13 : vector<8x32xf32> to vector<8x4x8xf32>
    %15 = tpu.transpose %14, [1, 0, 2] : vector<8x4x8xf32> -> vector<4x8x8xf32>
    %16 = arith.truncf %15 : vector<4x8x8xf32> to vector<4x8x8xbf16>
    %c0_12 = arith.constant 0 : index
    %c0_13 = arith.constant 0 : index
    %c0_14 = arith.constant 0 : index
    %c0_15 = arith.constant 0 : index
    %17 = vector.load %arg7[%c0_12, %c0_13, %c0_14, %c0_15] : memref<1x4x8x8xbf16, #tpu.memory_space<vmem>>, vector<1x4x8x8xbf16>
    %18 = vector.shape_cast %17 : vector<1x4x8x8xbf16> to vector<4x8x8xbf16>
    %19 = vector.shape_cast %16 : vector<4x8x8xbf16> to vector<1x4x8x8xbf16>
    tpu.vector_store %arg7[%c0_12, %c0_13, %c0_14, %c0_15], %19 {strides = array<i32>} : memref<1x4x8x8xbf16, #tpu.memory_space<vmem>>, vector<1x4x8x8xbf16>,
    %c0_16 = arith.constant 0 : index
    %c0_17 = arith.constant 0 : index
    %20 = vector.load %arg5[%c0_16, %c0_17] : memref<32x32xbf16, #tpu.memory_space<vmem>>, vector<32x32xbf16>
    %cst_18 = arith.constant dense<0.000000e+00> : vector<8x32xf32>
    %21 = tpu.matmul %1, %20, %cst_18 {dimension_numbers = #tpu.dot_dimension_numbers<[1], [0], [0], [1], [0, 0, 1, 1], [], []>} : vector<8x32xbf16>, vector<32x32xbf16>, vector<8x32xf32> -> vector<8x32xf32>
    %22 = vector.shape_cast %21 : vector<8x32xf32> to vector<8x4x8xf32>
    %23 = tpu.transpose %22, [1, 0, 2] : vector<8x4x8xf32> -> vector<4x8x8xf32>
    %24 = arith.truncf %23 : vector<4x8x8xf32> to vector<4x8x8xbf16>
    %c0_19 = arith.constant 0 : index
    %c0_20 = arith.constant 0 : index
    %c0_21 = arith.constant 0 : index
    %c0_22 = arith.constant 0 : index
    %25 = vector.load %arg8[%c0_19, %c0_20, %c0_21, %c0_22] : memref<1x4x8x8xbf16, #tpu.memory_space<vmem>>, vector<1x4x8x8xbf16>
    %26 = vector.shape_cast %25 : vector<1x4x8x8xbf16> to vector<4x8x8xbf16>
    %27 = vector.shape_cast %24 : vector<4x8x8xbf16> to vector<1x4x8x8xbf16>
    tpu.vector_store %arg8[%c0_19, %c0_20, %c0_21, %c0_22], %27 {strides = array<i32>} : memref<1x4x8x8xbf16, #tpu.memory_space<vmem>>, vector<1x4x8x8xbf16>,
    return
  }
  func.func @transform_0(%arg0: i32, %arg1: i32) -> (i32, i32, i32) {
    %c0_i32 = arith.constant 0 : i32
    %c0_i32_0 = arith.constant 0 : i32
    return %arg0, %arg1, %c0_i32 : i32, i32, i32
  }
  func.func @transform_1(%arg0: i32, %arg1: i32) -> (i32, i32) {
    %c0_i32 = arith.constant 0 : i32
    %c0_i32_0 = arith.constant 0 : i32
    %c0_i32_1 = arith.constant 0 : i32
    return %c0_i32, %c0_i32_0 : i32, i32
  }
  func.func @transform_2(%arg0: i32, %arg1: i32) -> (i32, i32) {
    %c0_i32 = arith.constant 0 : i32
    %c0_i32_0 = arith.constant 0 : i32
    %c0_i32_1 = arith.constant 0 : i32
    return %c0_i32, %c0_i32_0 : i32, i32
  }
  func.func @transform_3(%arg0: i32, %arg1: i32) -> (i32, i32) {
    %c0_i32 = arith.constant 0 : i32
    %c0_i32_0 = arith.constant 0 : i32
    %c0_i32_1 = arith.constant 0 : i32
    return %c0_i32, %c0_i32_0 : i32, i32
  }
  func.func @transform_4(%arg0: i32, %arg1: i32) -> (i32, i32, i32, i32) {
    %c0_i32 = arith.constant 0 : i32
    %c0_i32_0 = arith.constant 0 : i32
    %c0_i32_1 = arith.constant 0 : i32
    return %arg0, %c0_i32, %arg1, %c0_i32_0 : i32, i32, i32, i32
  }
  func.func @transform_5(%arg0: i32, %arg1: i32) -> (i32, i32, i32, i32) {
    %c0_i32 = arith.constant 0 : i32
    %c0_i32_0 = arith.constant 0 : i32
    %c0_i32_1 = arith.constant 0 : i32
    return %arg0, %c0_i32, %arg1, %c0_i32_0 : i32, i32, i32, i32
  }
  func.func @transform_6(%arg0: i32, %arg1: i32) -> (i32, i32, i32, i32) {
    %c0_i32 = arith.constant 0 : i32
    %c0_i32_0 = arith.constant 0 : i32
    %c0_i32_1 = arith.constant 0 : i32
    return %arg0, %c0_i32, %arg1, %c0_i32_0 : i32, i32, i32, i32
  }
}

</mosaic_0001>

<bundles_post_ra>
// kernel: tpu_custom_call.1
= control target key start
LH: loop header
LB: loop body
LE: loop exit
PB: predicated region body
PF: predicated region fallthrough
CT: control target
= control target key end

     0   :  { %s2095_s0 = inlined_call_operand.hbm [shape: bf16[2,8,32], index: 0, kind: input, shape index: {}]   ;;  %s2096_s1 = inlined_call_operand.hbm [shape: bf16[32,32], index: 1, kind: input, shape index: {}]   ;;  %s2097_s2 = inlined_call_operand.hbm [shape: bf16[32,32], index: 2, kind: input, shape index: {}]   ;;  %s2098_s3 = inlined_call_operand.hbm [shape: bf16[32,32], index: 3, kind: input, shape index: {}]   ;;  %s2099_s4 = inlined_call_operand.hbm [shape: bf16[2,4,8,8], index: 4, kind: output, shape index: {0}]   ;;  %s2100_s5 = inlined_call_operand.hbm [shape: bf16[2,4,8,8], index: 5, kind: output, shape index: {1}]   ;;  %s2101_s6 = inlined_call_operand.hbm [shape: bf16[2,4,8,8], index: 6, kind: output, shape index: {2}]  }
   0x1   :  { %2105 = sst [smem:[#allocation19_spill]] %s2096_s1 }
   0x2   :  { %2106 = sst [smem:[#allocation20_spill]] %s2097_s2 }
   0x3   :  { %12 = vsyncpa [#allocation3], 0 }
   0x4   :  { %14 = vsyncpa [#allocation3 + $0x1], 0 }
   0x5   :  { %15 = vsyncpa [#allocation6], 0 }
   0x6   :  { %16 = vsyncpa [#allocation9], 0 }
   0x7   :  { %17 = vsyncpa [#allocation4], 0 }
   0x8   :  { %19 = vsyncpa [#allocation4 + $0x1], 0 }
   0x9   :  { %20 = vsyncpa [#allocation12], 0 }
   0xa   :  { %22 = vsyncpa [#allocation12 + $0x1], 0  ;;  %s1729_s21 = smov 0   ;;  %s1731_s22 = smov 0  }
   0xb   :  { %s1733_s23 = smov 0   ;;  %s1735_s24 = smov 0  }
   0xc   :  { %s1737_s25 = smov 0   ;;  %s1739_s26 = smov 0  }
   0xd LB: > { %s1760_s27 = sadd.s32 4294967295, %s1674_s26   ;;  %s2104_s28 = sadd.s32 4294967294, %s1674_s26   ;;  %s1674_s26 = sphi %s1739_s26, %s28_s26   ;;  %s1670_s25 = sphi %s1737_s25, %s2128_s25   ;;  %s1666_s24 = sphi %s1735_s24, %s2127_s24   ;;  %s1662_s23 = sphi %s1733_s23, %s2126_s23   ;;  %s1658_s22 = sphi %s1731_s22, %s2125_s22   ;;  %s1654_s21 = sphi %s1729_s21, %s2124_s21  }
   0xe   : > { %p62_p0 = scmp.ne.s32.totalorder %s1658_s22, %s1654_s21  ;;  %p2102_p1 = scmp.eq.s32.totalorder %s1760_s27, 0 }
   0xf   : > { %p157_p3 = scmp.eq.s32.totalorder %s2104_s28, 1  ;;  %p1227_p5 = scmp.ge.s32.totalorder %s1674_s26, 1 }
  0x10   : > { %p1771_p4 = por %p2102_p1, %p62_p0  ;;  %p220_p7 = scmp.lt.s32.totalorder %s1674_s26, 3 }
  0x11   : > { %p1776_p6 = por %p157_p3, %p62_p0  ;;  %s1676_s8 = smov [#allocation5]  }
  0x12   : > { %s2107_s29 = scalar_select %p1771_p4, 1, 0 }
  0x13   : > { %s2108_s30 = scalar_select %p1776_p6, 1, 0 }
  0x14   : > { %p1781_p8 = pnand %p1227_p5, %p220_p7  ;;  %s232_s9 = sshll.u32 %s1676_s8, 4  ;;  %s233_s9 = int_to_ptr.vmem [resolvable:$true] %s232_s9 }
  0x15   : > { %s1677_s11 = smov [#allocation7]   ;;  %s1678_s13 = smov [#allocation8]  }
  0x16   : > { %p1324_p9 = pneg %p1781_p8  ;;  %s245_s12 = sshll.u32 %s1677_s11, 4  ;;  %s246_s12 = int_to_ptr.vmem [resolvable:$true] %s245_s12 }
  0x17   : > { %s258_s14 = sshll.u32 %s1678_s13, 4  ;;  %s1435_s15 = scalar_lea.vmem %s233_s9, 256  ;;  %s259_s14 = int_to_ptr.vmem [resolvable:$true] %s258_s14 }
  0x18   : > { %p1790_p11 = pnand %p1324_p9, %p2102_p1  ;;  %p1436_p13 = scmp.ne.s32.totalorder %s233_s9, %s1435_s15 }
  0x19   : > { %p1443_p5 = scmp.lt.s32.totalorder %s233_s9, %s233_s9  ;;  %p1444_p7 = scmp.lt.s32.totalorder %s1435_s15, %s1435_s15 }
  0x1a   : > { %p1426_p12 = pneg %p1790_p11 }
  0x1b   : > { %p1445_p9 = por %p1444_p7, %p1443_p5 }
  0x1c   : > { %p1438_p0 = pnand %p1436_p13, %p1426_p12 }
  0x1e   : > { %p1439_p3 = pneg %p1438_p0 }
  0x20   : > { %p1446_p10 = pnand %p1445_p9, %p1439_p3 }
  0x22   : > { %1449 = shalt.err (!%p1446_p10)
}
  0x23   : > { %s1679_s16 = smov 64   ;;  %s1680_s17 = smov 4  }
  0x24   : > { %s2111_s1 = sld [smem:[#allocation19_spill]]  ;;  %s1461_s20 = scalar_lea.vmem %s246_s12, 256 }
  0x25   : > { %p1462_p1 = scmp.ne.s32.totalorder %s246_s12, %s1461_s20  ;;  %p1469_p2 = scmp.lt.s32.totalorder %s246_s12, %s246_s12 }
  0x26   : > { %p1470_p6 = scmp.lt.s32.totalorder %s1461_s20, %s1461_s20 }
  0x27   : > { %p1464_p13 = pnand %p1462_p1, %p1426_p12 }
  0x28   : > { %p1471_p5 = por %p1470_p6, %p1469_p2 }
  0x29   : > { %p1465_p0 = pneg %p1464_p13 }
  0x2a   : > { %1327 = dma.hbm_to_vmem [thread:$0]  (!%p1790_p11), %s2111_s1, 256, %s233_s9, [#allocation6], %s1679_s16, %s1679_s16, %s1680_s17  }
  0x2b   : > { %p1472_p3 = pnand %p1471_p5, %p1465_p0 }
  0x2d   : > { %1475 = shalt.err (!%p1472_p3)
}
  0x2e   : > { %s2112_s2 = sld [smem:[#allocation20_spill]]  ;;  %s1487_s9 = scalar_lea.vmem %s259_s14, 256 }
  0x2f   : > { %p1488_p10 = scmp.ne.s32.totalorder %s259_s14, %s1487_s9  ;;  %p1495_p9 = scmp.lt.s32.totalorder %s259_s14, %s259_s14 }
  0x30   : > { %p1496_p13 = scmp.lt.s32.totalorder %s1487_s9, %s1487_s9 }
  0x31   : > { %p1490_p7 = pnand %p1488_p10, %p1426_p12 }
  0x32   : > { %p1497_p4 = por %p1496_p13, %p1495_p9 }
  0x33   : > { %p1491_p1 = pneg %p1490_p7 }
  0x34   : > { %1330 = dma.hbm_to_vmem [thread:$0]  (!%p1790_p11), %s2112_s2, 256, %s246_s12, [#allocation6], %s1679_s16, %s1679_s16, %s1680_s17  }
  0x35   : > { %p1498_p2 = pnand %p1497_p4, %p1491_p1 }
  0x37   : > { %1501 = shalt.err (!%p1498_p2)
}
  0x38   : > { %1333 = dma.hbm_to_vmem [thread:$0]  (!%p1790_p11), %s2098_s3, 256, %s259_s14, [#allocation9], %s1679_s16, %s1679_s16, %s1680_s17  }
  0x39   : > { %s49_s12 = sadd.s32 1, %s1662_s23  ;;  %s40_s18 = sadd.s32 1, %s1670_s25 }
  0x3a   : > { %p56_p4 = scmp.ne.s32.totalorder %s1662_s23, %s1658_s22  ;;  %p42_p6 = scmp.ge.s32.totalorder %s40_s18, 2 }
  0x3b   : > { %p57_p12 = scmp.eq.s32.totalorder %s1674_s26, 0  ;;  %p2113_p0 = scmp.eq.s32.totalorder %s1760_s27, 1 }
  0x3c   : > { %p1351_p3 = scmp.lt.s32.totalorder %s1674_s26, 2  ;;  %s2130_s18 = smov (%p42_p6, %s40_s18), 0 }
  0x3d   : > { %p1827_p5 = por %p2113_p0, %p56_p4  ;;  %p58_p10 = por %p57_p12, %p56_p4 }
  0x3e   : > { %s272_s19 = sand.u32 1, %s1662_s23   ;;  %s44_s20 = ssub.s32 %s1670_s25, %s2130_s18 }
  0x3f   : > { %p47_p7 = scmp.eq.s32.totalorder %s44_s20, 0  ;;  %s1232_s14 = sshll.u32 %s272_s19, 2 }
  0x40   : > { %s1233_s16 = sshll.u32 %s1670_s25, 6  ;;  %s276_s13 = scalar_lea.vmem [#allocation2], %s1232_s14 }
  0x41   : > { %s1839_s17 = scalar_select %p47_p7, %s1662_s23, %s49_s12  }
  0x42   : > { %s282_s9 = scalar_lea.hbm %s2095_s0, %s1233_s16  ;;  %s284_s15 = sshll.u32 %s276_s13, 4  ;;  %s285_s15 = int_to_ptr.vmem [resolvable:$true] %s284_s15 }
  0x43   : > { %p1846_p11 = pnand %p1351_p3, %p58_p10  ;;  %s273_s1 = scalar_lea.sflag [#allocation3], %s272_s19 }
  0x44   : > { %s1515_s20 = scalar_lea.vmem %s285_s15, 64  ;;  %s1681_s12 = smov [#allocation2]  }
  0x45   : > { %p1504_p1 = pneg %p1846_p11  ;;  %p1516_p9 = scmp.ne.s32.totalorder %s285_s15, %s1515_s20 }
  0x46   : > { %s1520_s2 = sshll.u32 %s1681_s12, 4  ;;  %s1521_s2 = int_to_ptr.vmem [resolvable:$false] %s1520_s2 }
  0x47   : > { %p1518_p13 = pnand %p1516_p9, %p1504_p1  ;;  %s1522_s16 = scalar_lea.vmem %s1521_s2, 128 }
  0x48   : > { %p1523_p4 = scmp.lt.s32.totalorder %s285_s15, %s1521_s2  ;;  %p1524_p6 = scmp.lt.s32.totalorder %s1522_s16, %s1515_s20 }
  0x49   : > { %p1519_p2 = pneg %p1518_p13 }
  0x4a   : > { %p1525_p12 = por %p1524_p6, %p1523_p4 }
  0x4c   : > { %p1526_p0 = pnand %p1525_p12, %p1519_p2 }
  0x4e   : > { %1529 = shalt.err (!%p1526_p0)
}
  0x4f   : > { %1337 = dma.hbm_to_vmem [thread:$0]  (!%p1846_p11), %s282_s9, 64, %s285_s15, %s273_s1  }
  0x50   : > { %293 = sbr.rel (%p1781_p8) target bundleno = 498 (0x1f2), region = 36  ;;  %s1857_s19 = sand.u32 (!%p1781_p8), 1, %s1658_s22  }
  0x51   : > { %s1235_s14 = sshll.u32 (!%p1781_p8), %s1857_s19, 2  ;;  %s296_s8 = scalar_lea.sflag (!%p1781_p8), [#allocation3], %s1857_s19 }
  0x52   : > { %s299_s11 = scalar_lea.vmem (!%p1781_p8), [#allocation2], %s1235_s14  ;;  %p2116_p3 = scmp.ne.s32.totalorder (!%p1781_p8), %s2107_s29, 0 }
  0x55   : > { %1633 = dma.done.wait (%p2116_p3), %s296_s8, 64  }
  0x56   : > { %1635 = vsyncadd (%p2116_p3), %s296_s8, 4294967232  ;;  %p2117_p10 = scmp.eq.s32.totalorder %s1760_s27, 0 }
  0x58   : > { %1637 = dma.done.wait (%p2117_p10), [#allocation6], 512   ;;  %p2118_p7 = pmov %p2117_p10 }
  0x5a   : > { %1639 = vsyncadd (%p2118_p7), [#allocation6], 4294966784  ;;  %p2119_p8 = pmov %p2118_p7 }
  0x5b   : > { %p2120_p11 = pmov %p2118_p7 }
  0x5c   : > { %1641 = dma.done.wait (%p2119_p8), [#allocation9], 256  }
  0x5d   : > { %1643 = vsyncadd (%p2120_p11), [#allocation9], 4294967040  ;;  %v1682_v0 = vmov 0.0   ;;  %vm1683_vm0 = vmmov 0   ;;  %v1418_v1 = vld [vmem:[#allocation5 + $0x8] sm:$0xff]   ;;  %v1419_v2 = vld [vmem:[#allocation7 + $0x8] sm:$0xff]   ;;  %v428_v23 = vlaneseq }
  0x5e   : > { %1280 = vmatprep.subr.bf16.mxu0 %v1682_v0  ;;  %1288 = vmatprep.subr.bf16.mxu1 %v1682_v0  ;;  %v1420_v3 = vld [vmem:[#allocation5] sm:$0xff]   ;;  %v1421_v4 = vld [vmem:[#allocation7] sm:$0xff]   ;;  %v351_v5 = vld [vmem:[%s299_s11] sm:$0xf]  ;;  %vm368_vm1 = vcmask 261120   ;;  %s1684_s1 = smov 104  }
  0x5f   : > { %1284 = vmatprep.mubr.msk.bf16.mxu0 %vm1683_vm0, %v1682_v0  ;;  %1292 = vmatprep.mubr.msk.bf16.mxu1 %vm1683_vm0, %v1682_v0  ;;  %v1422_v6 = vld [vmem:[#allocation8 + $0x8] sm:$0xff]   ;;  %v1423_v7 = vld [vmem:[#allocation8] sm:$0xff]   ;;  %s1685_s2 = smov 120   ;;  %s1686_s28 = smov 112   ;;  %v1687_v21 = vmov 1983009808  }
  0x60   : > { %1281 = vmatpush3.bf16.msra.mxu0 %v1418_v1  ;;  %1289 = vmatpush3.bf16.msra.mxu1 %v1419_v2  ;;  %v426_v22 = vunpack.c.l.s4 %v1687_v21  ;;  %v1688_v24 = vmov 1934713408   ;;  %v429_v27 = vshrl.u32 %v428_v23, 7  ;;  %vm563_vm2 = vcmask 60416   ;;  %s1908_s29 = sshll.u32 %s1857_s19, 4  ;;  %s993_s7 = sand.u32 1, %s1760_s27  }
  0x61   : > { %1282 = vmatprep.subr.bf16.mxu0 %v1682_v0  ;;  %1290 = vmatprep.subr.bf16.mxu1 %v1682_v0  ;;  %v458_v25 = vunpack.c.l.s4 %v1688_v24  ;;  %s1920_s9 = sshll.u32 %s1666_s24, 8  ;;  %s342_s13 = scalar_lea.vmem [#allocation11], %s1908_s29 }
  0x62   : > { %v427_v26 = vunpack.c.0.s8 %v426_v22  ;;  %s1030_s15 = sshll.u32 %s342_s13, 4  ;;  %s1927_s12 = scalar_lea.hbm %s2100_s5, %s1920_s9  ;;  %s1929_s15 = int_to_ptr.vmem [resolvable:$true] %s1030_s15 }
  0x63   : > { %v459_v30 = vunpack.c.0.s8 %v458_v25  ;;  %s1944_s16 = scalar_lea.vmem [#allocation10], %s1908_s29  ;;  %s1949_s8 = scalar_lea.sflag [#allocation12], %s993_s7 }
  0x64   : > { %1283 = vmatpush3.bf16.msra.mxu0 %v1420_v3  ;;  %1291 = vmatpush3.bf16.msra.mxu1 %v1421_v4  ;;  %v1881_v31 = vsub.s32 %v427_v26, %v429_v27  ;;  %s1013_s14 = sshll.u32 %s1944_s16, 4  ;;  %s1530_s11 = scalar_lea.vmem %s1929_s15, 256  ;;  %s1987_s14 = int_to_ptr.vmem [resolvable:$true] %s1013_s14 }
  0x65   : > { %1296 = vmatprep.subr.bf16.mxu0 %v1682_v0  ;;  %v1883_v38 = vsub.s32 %v459_v30, %v429_v27  ;;  %p1531_p1 = scmp.ne.s32.totalorder %s1929_s15, %s1530_s11 }
  0x67   : > { %1285 = vmatmul.mubr.msk.bf16.vlgmr.msra.gmra.mxu0 %vm368_vm1, %v351_v5  ;;  %1293 = vmatmul.mubr.msk.bf16.vlgmr.msra.gmra.mxu1 %vm368_vm1, %v351_v5  ;;  %p1532_p9 = pnand %p1531_p1, %p1827_p5 }
  0x68   : > { %1297 = vmatpush3.bf16.msra.mxu0 %v1422_v6  ;;  %1300 = vmatprep.mubr.msk.bf16.mxu0 %vm1683_vm0, %v1682_v0 }
  0x69   : > { %1298 = vmatprep.subr.bf16.mxu0 %v1682_v0  ;;  %p1533_p13 = pneg %p1532_p9 }
  0x6c   : > { %1299 = vmatpush3.bf16.msra.mxu0 %v1423_v7 }
  0x6f   : > { %1301 = vmatmul.mubr.msk.bf16.vlgmr.msra.gmra.mxu0 %vm368_vm1, %v351_v5 }
 0x127   : > { %v406_v8 = vpop.f32.mrf.mxu0  ;;  %v618_v9 = vpop.f32.mrf.mxu1 }
 0x128   : > { %v412_v10 = vmul.f32 0.35355338, %v406_v8  ;;  %631 = vrot.lane.b32.xlu1 %v618_v9, %s1684_s1  ;;  %625 = vrot.lane.b32.xlu0 %v618_v9, %s1685_s2 }
 0x129   : > { %v1286_v11 = vpop.f32.mrf.mxu0  ;;  %v1294_v12 = vpop.f32.mrf.mxu1 }
 0x12b   : > { %v409_v13 = vpop.f32.mrf.mxu0  ;;  %v621_v14 = vpop.f32.mrf.mxu1 }
 0x12c   : > { %628 = vrot.lane.b32.xlu0 %v618_v9, %s1686_s28  ;;  %414 = vrot.lane.b32.xlu1 %v412_v10, %s1685_s2 }
 0x12d   : > { %v1287_v15 = vpop.f32.mrf.mxu0  ;;  %v1295_v16 = vpop.f32.mrf.mxu1 }
 0x12f   : > { %v1876_v17 = vpop.f32.mrf.mxu0 }
 0x130   : > { %417 = vrot.lane.b32.xlu0 %v412_v10, %s1686_s28  ;;  %420 = vrot.lane.b32.xlu1 %v412_v10, %s1684_s1 }
 0x131   : > { %v1302_v18 = vpop.f32.mrf.mxu0 }
 0x133   : > { %v831_v19 = vpop.f32.mrf.mxu0 }
 0x134   : > { %838 = vrot.lane.b32.xlu1 %v1876_v17, %s1686_s28  ;;  %835 = vrot.lane.b32.xlu0 %v1876_v17, %s1685_s2 }
 0x135   : > { %v1303_v20 = vpop.f32.mrf.mxu0 }
 0x138   : > { %841 = vrot.lane.b32.xlu0 %v1876_v17, %s1684_s1  ;;  %s1689_s1 = smov [#allocation11]  }
 0x139   : > { %s1534_s2 = sshll.u32 %s1689_s1, 4  ;;  %s1535_s2 = int_to_ptr.vmem [resolvable:$false] %s1534_s2 }
 0x13a   : > { %s1536_s28 = scalar_lea.vmem %s1535_s2, 512  ;;  %p1537_p2 = scmp.lt.s32.totalorder %s1929_s15, %s1535_s2 }
 0x13b   : > { %p1538_p4 = scmp.lt.s32.totalorder %s1536_s28, %s1530_s11 }
 0x13d   : > { %p1539_p6 = por %p1538_p4, %p1537_p2 }
 0x13f   : > { %p1540_p12 = pnand %p1539_p6, %p1533_p13 }
 0x19a   : > { %v632_v28 = vpop.permute.xlu1 %631  ;;  %v626_v29 = vpop.permute.xlu0 %625 }
 0x19b   : > { %v650_v32 = vcombine.low %v626_v29, %v632_v28  ;;  %v651_v33 = vcombine.high %v626_v29, %v632_v28 }
 0x19d   : > { %v658_v39 = vrot.slane %v650_v32, %v1881_v31  ;;  %v665_v40 = vrot.slane %v651_v33, %v1881_v31 }
 0x19e   : > { %v629_v34 = vpop.permute.xlu0 %628  ;;  %v415_v35 = vpop.permute.xlu1 %414 }
 0x19f   : > { %v634_v36 = vcombine.low %v618_v9, %v629_v34  ;;  %v635_v37 = vcombine.high %v618_v9, %v629_v34 }
 0x1a1   : > { %v642_v41 = vrot.slane %v634_v36, %v1881_v31  ;;  %v649_v42 = vrot.slane %v635_v37, %v1881_v31 }
 0x1a2   : > { %v418_v43 = vpop.permute.xlu0 %417  ;;  %v421_v44 = vpop.permute.xlu1 %420 }
 0x1a3   : > { %v666_v45 = vcombine.low %v642_v41, %v658_v39  ;;  %v667_v46 = vcombine.high %v642_v41, %v658_v39  ;;  %v682_v47 = vcombine.low %v649_v42, %v665_v40  ;;  %v683_v48 = vcombine.high %v649_v42, %v665_v40 }
 0x1a4   : > { %v423_v49 = vcombine.low %v412_v10, %v418_v43  ;;  %v424_v50 = vcombine.high %v412_v10, %v418_v43  ;;  %v439_v51 = vcombine.low %v415_v35, %v421_v44  ;;  %v440_v52 = vcombine.high %v415_v35, %v421_v44 }
 0x1a5   : > { %v674_v53 = vrot.slane %v666_v45, %v1883_v38  ;;  %v681_v54 = vrot.slane %v667_v46, %v1883_v38  ;;  %v690_v55 = vrot.slane %v682_v47, %v1883_v38  ;;  %v697_v56 = vrot.slane %v683_v48, %v1883_v38 }
 0x1a6   : > { %v431_v57 = vrot.slane %v423_v49, %v1881_v31  ;;  %v438_v58 = vrot.slane %v424_v50, %v1881_v31  ;;  %v447_v59 = vrot.slane %v439_v51, %v1881_v31  ;;  %v454_v60 = vrot.slane %v440_v52, %v1881_v31  ;;  %v1905_v13 = vpop.permute.xlu0 %835  ;;  %v839_v41 = vpop.permute.xlu1 %838 }
 0x1a7   : > { %v702_v61 = vcombine.low %v674_v53, %v681_v54  ;;  %v1250_v62 = vcombine.high %v674_v53, %v681_v54  ;;  %v718_v63 = vcombine.low %v690_v55, %v697_v56  ;;  %v1251_v0 = vcombine.high %v690_v55, %v697_v56 }
 0x1a8   : > { %v455_v1 = vcombine.low %v431_v57, %v447_v59  ;;  %v456_v2 = vcombine.high %v431_v57, %v447_v59  ;;  %v471_v3 = vcombine.low %v438_v58, %v454_v60  ;;  %v472_v4 = vcombine.high %v438_v58, %v454_v60 }
 0x1a9   : > { %v709_v5 = vrot.slane %v702_v61, %v1881_v31  ;;  %v717_v6 = vrot.slane %v1250_v62, %v1881_v31  ;;  %v725_v7 = vrot.slane %v718_v63, %v1881_v31  ;;  %v733_v8 = vrot.slane %v1251_v0, %v1881_v31 }
 0x1aa   : > { %v463_v9 = vrot.slane %v455_v1, %v1883_v38  ;;  %v470_v10 = vrot.slane %v456_v2, %v1883_v38  ;;  %v479_v11 = vrot.slane %v471_v3, %v1883_v38  ;;  %v486_v12 = vrot.slane %v472_v4, %v1883_v38  ;;  %v842_v42 = vpop.permute.xlu0 %841 }
 0x1ab   : > { %v734_v14 = vcombine.low %v709_v5, %v717_v6  ;;  %v735_v15 = vcombine.high %v709_v5, %v717_v6  ;;  %v750_v16 = vcombine.low %v725_v7, %v733_v8  ;;  %v751_v18 = vcombine.high %v725_v7, %v733_v8 }
 0x1ac   : > { %v491_v19 = vcombine.low %v463_v9, %v470_v10  ;;  %v1245_v20 = vcombine.high %v463_v9, %v470_v10  ;;  %v507_v21 = vcombine.low %v479_v11, %v486_v12  ;;  %v1246_v22 = vcombine.high %v479_v11, %v486_v12 }
 0x1ad   : > { %v742_v23 = vrot.slane %v734_v14, %v1883_v38  ;;  %v749_v24 = vrot.slane %v735_v15, %v1883_v38  ;;  %v758_v25 = vrot.slane %v750_v16, %v1883_v38  ;;  %v765_v26 = vrot.slane %v751_v18, %v1883_v38 }
 0x1ae   : > { %v498_v27 = vrot.slane %v491_v19, %v1881_v31  ;;  %v506_v28 = vrot.slane %v1245_v20, %v1881_v31  ;;  %v514_v29 = vrot.slane %v507_v21, %v1881_v31  ;;  %v522_v30 = vrot.slane %v1246_v22, %v1881_v31 }
 0x1af   : > { %v766_v32 = vcombine.low %v742_v23, %v758_v25  ;;  %v767_v33 = vcombine.high %v742_v23, %v758_v25  ;;  %v768_v34 = vcombine.low %v749_v24, %v765_v26  ;;  %v769_v35 = vcombine.high %v749_v24, %v765_v26 }
 0x1b0   : > { %v523_v36 = vcombine.low %v498_v27, %v506_v28  ;;  %v524_v37 = vcombine.high %v498_v27, %v506_v28  ;;  %v539_v39 = vcombine.low %v514_v29, %v522_v30  ;;  %v540_v40 = vcombine.high %v514_v29, %v522_v30 }
 0x1b1   : > { %v770_v43 = vpack.c.bf16 %v766_v32, %v766_v32  ;;  %v771_v44 = vpack.c.bf16 %v767_v33, %v767_v33  ;;  %v772_v45 = vpack.c.bf16 %v768_v34, %v768_v34  ;;  %v773_v46 = vpack.c.bf16 %v769_v35, %v769_v35 }
 0x1b2   : > { %v531_v47 = vrot.slane %v523_v36, %v1883_v38  ;;  %v538_v48 = vrot.slane %v524_v37, %v1883_v38  ;;  %v547_v49 = vrot.slane %v539_v39, %v1883_v38  ;;  %v554_v50 = vrot.slane %v540_v40, %v1883_v38 }
 0x1b3   : > { %v844_v51 = vcombine.low %v1876_v17, %v839_v41  ;;  %v845_v52 = vcombine.high %v1876_v17, %v839_v41  ;;  %v860_v53 = vcombine.low %v1905_v13, %v842_v42  ;;  %v861_v54 = vcombine.high %v1905_v13, %v842_v42  ;;  %774 = vst.msk [vmem:[%s342_s13] sm:$0xf] %vm563_vm2, %v770_v43 }
 0x1b4   : > { %775 = vst.msk [vmem:[%s342_s13 + $0x4] sm:$0xf] %vm563_vm2, %v771_v44  ;;  %776 = vst.msk [vmem:[%s342_s13 + $0x8] sm:$0xf] %vm563_vm2, %v772_v45  ;;  %v555_v55 = vcombine.low %v531_v47, %v547_v49  ;;  %v556_v17 = vcombine.high %v531_v47, %v547_v49  ;;  %v557_v56 = vcombine.low %v538_v48, %v554_v50 }
 0x1b5   : > { %777 = vst.msk [vmem:[%s342_s13 + $0xc] sm:$0xf] %vm563_vm2, %v773_v46  ;;  %v558_v57 = vcombine.high %v538_v48, %v554_v50 }
 0x1b6   : > { %1543 = shalt.err (!%p1540_p12)
}
 0x1b7   : > { %s1544_s27 = scalar_lea.hbm %s1927_s12, 256  ;;  %s1548_s24 = scalar_lea.hbm %s2100_s5, 512 }
 0x1b8   : > { %p1545_p0 = scmp.ne.s32.totalorder %s1927_s12, %s1544_s27  ;;  %p1549_p7 = scmp.lt.s32.totalorder %s1927_s12, %s2100_s5 }
 0x1b9   : > { %p1550_p8 = scmp.lt.s32.totalorder %s1548_s24, %s1544_s27 }
 0x1ba   : > { %p1546_p3 = pnand %p1545_p0, %p1827_p5 }
 0x1bb   : > { %p1551_p11 = por %p1550_p8, %p1549_p7 }
 0x1bc   : > { %p1547_p10 = pneg %p1546_p3 }
 0x1be   : > { %p1552_p1 = pnand %p1551_p11, %p1547_p10 }
 0x1c0   : > { %1555 = shalt.err (!%p1552_p1)
}
 0x1c1   : > { %s1690_s11 = smov 64   ;;  %s1691_s2 = smov 4   ;;  %v852_v58 = vrot.slane %v844_v51, %v1881_v31  ;;  %v859_v59 = vrot.slane %v845_v52, %v1881_v31  ;;  %v868_v60 = vrot.slane %v860_v53, %v1881_v31  ;;  %v875_v61 = vrot.slane %v861_v54, %v1881_v31 }
 0x1c2   : > { %1319 = dma.vmem_to_hbm [thread:$0]  (%p1827_p5), %s1929_s15, 256, %s1927_s12, %s1949_s8, %s1690_s11, %s1690_s11, %s1691_s2   ;;  %v559_v62 = vpack.c.bf16 %v555_v55, %v555_v55  ;;  %v560_v63 = vpack.c.bf16 %v556_v17, %v556_v17  ;;  %v561_v0 = vpack.c.bf16 %v557_v56, %v557_v56  ;;  %v562_v1 = vpack.c.bf16 %v558_v57, %v558_v57 }
 0x1c3   : > { %s1983_s15 = scalar_lea.hbm %s2099_s4, %s1920_s9  ;;  %v876_v2 = vcombine.low %v852_v58, %v868_v60  ;;  %v877_v3 = vcombine.high %v852_v58, %v868_v60  ;;  %v892_v4 = vcombine.low %v859_v59, %v875_v61  ;;  %v893_v5 = vcombine.high %v859_v59, %v875_v61  ;;  %s989_s12 = scalar_lea.sflag [#allocation4], %s1857_s19 }
 0x1c4   : > { %564 = vst.msk [vmem:[%s1944_s16] sm:$0xf] %vm563_vm2, %v559_v62  ;;  %565 = vst.msk [vmem:[%s1944_s16 + $0x4] sm:$0xf] %vm563_vm2, %v560_v63  ;;  %s1556_s7 = scalar_lea.vmem %s1987_s14, 256  ;;  %s1692_s13 = smov [#allocation10]  }
 0x1c5   : > { %566 = vst.msk [vmem:[%s1944_s16 + $0x8] sm:$0xf] %vm563_vm2, %v561_v0  ;;  %567 = vst.msk [vmem:[%s1944_s16 + $0xc] sm:$0xf] %vm563_vm2, %v562_v1  ;;  %v884_v6 = vrot.slane %v876_v2, %v1883_v38  ;;  %v891_v7 = vrot.slane %v877_v3, %v1883_v38  ;;  %v900_v8 = vrot.slane %v892_v4, %v1883_v38  ;;  %p1557_p9 = scmp.ne.s32.totalorder %s1987_s14, %s1556_s7  ;;  %s1560_s24 = sshll.u32 %s1692_s13, 4  ;;  %s1561_s24 = int_to_ptr.vmem [resolvable:$false] %s1560_s24 }
 0x1c6   : > { %v907_v9 = vrot.slane %v893_v5, %v1883_v38  ;;  %s1562_s20 = scalar_lea.vmem %s1561_s24, 512  ;;  %p1563_p4 = scmp.lt.s32.totalorder %s1987_s14, %s1561_s24 }
 0x1c7   : > { %p1558_p13 = pnand %p1557_p9, %p1827_p5  ;;  %p1564_p6 = scmp.lt.s32.totalorder %s1562_s20, %s1556_s7 }
 0x1c9   : > { %p1559_p2 = pneg %p1558_p13  ;;  %p1565_p12 = por %p1564_p6, %p1563_p4 }
 0x1cb   : > { %p1566_p0 = pnand %p1565_p12, %p1559_p2 }
 0x1cd   : > { %1569 = shalt.err (!%p1566_p0)
}
 0x1ce   : > { %s1570_s16 = scalar_lea.hbm %s1983_s15, 256  ;;  %s1574_s28 = scalar_lea.hbm %s2099_s4, 512 }
 0x1cf   : > { %p1571_p3 = scmp.ne.s32.totalorder %s1983_s15, %s1570_s16  ;;  %p1575_p8 = scmp.lt.s32.totalorder %s1983_s15, %s2099_s4 }
 0x1d0   : > { %p1576_p11 = scmp.lt.s32.totalorder %s1574_s28, %s1570_s16 }
 0x1d1   : > { %p1572_p10 = pnand %p1571_p3, %p1827_p5 }
 0x1d2   : > { %p1577_p1 = por %p1576_p11, %p1575_p8 }
 0x1d3   : > { %p1573_p7 = pneg %p1572_p10 }
 0x1d5   : > { %p1578_p9 = pnand %p1577_p1, %p1573_p7 }
 0x1d7   : > { %1581 = shalt.err (!%p1578_p9)
}
 0x1d8   : > { %1318 = dma.vmem_to_hbm [thread:$0]  (%p1827_p5), %s1987_s14, 256, %s1983_s15, %s989_s12, %s1690_s11, %s1690_s11, %s1691_s2   ;;  %v912_v10 = vcombine.low %v884_v6, %v891_v7  ;;  %v1255_v11 = vcombine.high %v884_v6, %v891_v7  ;;  %v928_v12 = vcombine.low %v900_v8, %v907_v9  ;;  %v1256_v13 = vcombine.high %v900_v8, %v907_v9 }
 0x1d9   : > { %s349_s14 = scalar_lea.vmem [#allocation13], %s1908_s29  ;;  %s2038_s24 = scalar_lea.hbm %s2101_s6, %s1920_s9 }
 0x1da   : > { %v919_v14 = vrot.slane %v912_v10, %v1881_v31  ;;  %v927_v15 = vrot.slane %v1255_v11, %v1881_v31  ;;  %v935_v16 = vrot.slane %v928_v12, %v1881_v31  ;;  %v943_v18 = vrot.slane %v1256_v13, %v1881_v31  ;;  %s1047_s15 = sshll.u32 %s349_s14, 4  ;;  %s1693_s9 = smov [#allocation13]   ;;  %s2040_s15 = int_to_ptr.vmem [resolvable:$true] %s1047_s15 }
 0x1db   : > { %s1582_s29 = scalar_lea.vmem %s2040_s15, 256  ;;  %s1586_s20 = sshll.u32 %s1693_s9, 4  ;;  %s1587_s20 = int_to_ptr.vmem [resolvable:$false] %s1586_s20 }
 0x1dc   : > { %v944_v19 = vcombine.low %v919_v14, %v927_v15  ;;  %v945_v20 = vcombine.high %v919_v14, %v927_v15  ;;  %v960_v21 = vcombine.low %v935_v16, %v943_v18  ;;  %v961_v22 = vcombine.high %v935_v16, %v943_v18  ;;  %p1583_p13 = scmp.ne.s32.totalorder %s2040_s15, %s1582_s29  ;;  %s1588_s16 = scalar_lea.vmem %s1587_s20, 512 }
 0x1dd   : > { %p1589_p6 = scmp.lt.s32.totalorder %s2040_s15, %s1587_s20  ;;  %p1590_p12 = scmp.lt.s32.totalorder %s1588_s16, %s1582_s29 }
 0x1de   : > { %v952_v23 = vrot.slane %v944_v19, %v1883_v38  ;;  %v959_v24 = vrot.slane %v945_v20, %v1883_v38  ;;  %v968_v25 = vrot.slane %v960_v21, %v1883_v38  ;;  %v975_v26 = vrot.slane %v961_v22, %v1883_v38  ;;  %p1584_p2 = pnand %p1583_p13, %p1827_p5 }
 0x1df   : > { %p1591_p0 = por %p1590_p12, %p1589_p6 }
 0x1e0   : > { %v976_v27 = vcombine.low %v952_v23, %v968_v25  ;;  %v977_v28 = vcombine.high %v952_v23, %v968_v25  ;;  %v978_v29 = vcombine.low %v959_v24, %v975_v26  ;;  %v979_v31 = vcombine.high %v959_v24, %v975_v26  ;;  %p1585_p4 = pneg %p1584_p2 }
 0x1e2   : > { %v980_v30 = vpack.c.bf16 %v976_v27, %v976_v27  ;;  %v981_v32 = vpack.c.bf16 %v977_v28, %v977_v28  ;;  %v982_v33 = vpack.c.bf16 %v978_v29, %v978_v29  ;;  %v983_v34 = vpack.c.bf16 %v979_v31, %v979_v31  ;;  %p1592_p3 = pnand %p1591_p0, %p1585_p4 }
 0x1e4   : > { %984 = vst.msk [vmem:[%s349_s14] sm:$0xf] %vm563_vm2, %v980_v30  ;;  %985 = vst.msk [vmem:[%s349_s14 + $0x4] sm:$0xf] %vm563_vm2, %v981_v32 }
 0x1e5   : > { %986 = vst.msk [vmem:[%s349_s14 + $0x8] sm:$0xf] %vm563_vm2, %v982_v33  ;;  %987 = vst.msk [vmem:[%s349_s14 + $0xc] sm:$0xf] %vm563_vm2, %v983_v34 }
 0x1e6   : > { %1595 = shalt.err (!%p1592_p3)
}
 0x1e7   : > { %s1596_s19 = scalar_lea.hbm %s2038_s24, 256  ;;  %s1600_s27 = scalar_lea.hbm %s2101_s6, 512 }
 0x1e8   : > { %p1597_p10 = scmp.ne.s32.totalorder %s2038_s24, %s1596_s19  ;;  %p1601_p11 = scmp.lt.s32.totalorder %s2038_s24, %s2101_s6 }
 0x1e9   : > { %p1602_p1 = scmp.lt.s32.totalorder %s1600_s27, %s1596_s19 }
 0x1ea   : > { %p1598_p7 = pnand %p1597_p10, %p1827_p5 }
 0x1eb   : > { %p1603_p9 = por %p1602_p1, %p1601_p11 }
 0x1ec   : > { %p1599_p8 = pneg %p1598_p7 }
 0x1ee   : > { %p1604_p13 = pnand %p1603_p9, %p1599_p8 }
 0x1f0   : > { %1607 = shalt.err (!%p1604_p13)
}
 0x1f1   : > { %1320 = dma.vmem_to_hbm [thread:$0]  (%p1827_p5), %s2040_s15, 256, %s2038_s24, %s1949_s8, %s1690_s11, %s1690_s11, %s1691_s2  }
 0x1f2 PF: > { %s1062_s12 = sand.u32 1, %s1654_s21   ;;  %p2121_p2 = scmp.ne.s32.totalorder %s2108_s30, 0 }
 0x1f3   : > { %p2122_p4 = scmp.ge.s32.totalorder %s1674_s26, 2  ;;  %s1063_s7 = scalar_lea.sflag [#allocation4], %s1062_s12 }
 0x1f5   : > { %p1339_p6 = pnand %p2122_p4, %p2121_p2 }
 0x1f7   : > { %p1340_p12 = pneg %p1339_p6 }
 0x1f9   : > { %1645 = dma.done.wait (%p1340_p12), %s1063_s7, 256  }
 0x1fa   : > { %1647 = vsyncadd (%p1340_p12), %s1063_s7, 4294967040  ;;  %s2123_s10 = sadd.s32 4294967294, %s1674_s26  }
 0x1fb   : > { %s1071_s29 = sand.u32 1, %s2123_s10  }
 0x1fc   : > { %s1072_s9 = scalar_lea.sflag [#allocation12], %s1071_s29 }
 0x1fd   : > { %1649 = dma.done.wait (%p1340_p12), %s1072_s9, 512  }
 0x1fe   : > { %1651 = vsyncadd (%p1340_p12), %s1072_s9, 4294966784  ;;  %s28_s26 = sadd.s32 1, %s1674_s26   ;;  %s2124_s21 = smov %s1658_s22 }
 0x1ff   : > { %p25_p5 = scmp.ge.s32.totalorder %s28_s26, 4   ;;  %s2125_s22 = smov %s1662_s23 }
 0x200   : > { %s2126_s23 = smov %s1839_s17  ;;  %s2127_s24 = smov %s1670_s25 }
 0x201   : > { %s2128_s25 = smov %s2130_s18  ;;  %27 = sbr.rel (!%p25_p5) target bundleno = 13 (0xd), region = 125 }
 0x206   :  { %1086 = vsyncpa [#allocation3], 1 }
 0x207   :  { %1088 = vsyncpa [#allocation3 + $0x1], 1 }
 0x208   :  { %1089 = vsyncpa [#allocation6], 1 }
 0x209   :  { %1090 = vsyncpa [#allocation9], 1 }
 0x20a   :  { %1091 = vsyncpa [#allocation4], 1 }
 0x20b   :  { %1093 = vsyncpa [#allocation4 + $0x1], 1 }
 0x20c   :  { %1094 = vsyncpa [#allocation12], 1 }
 0x20d   :  { %1096 = vsyncpa [#allocation12 + $0x1], 1 }

</bundles_post_ra>
